<compile_context>
chip_gen: v5e
topology: v5e:2x2
jax: 0.10.0
libtpu: 0.0.40
codegen_flags: <defaults>
</compile_context>

<pallas_src>
import functools

import jax
import jax.numpy as jnp
from jax.experimental import pallas as pl
from jax.experimental.pallas import tpu as pltpu


def _round_up(x, m):
    return (x + m - 1) // m * m


def _vmem_capacity_bytes():
    """Physical VMEM per TensorCore; conservative (v7x-sized) fallback."""
    try:
        return int(pltpu.get_tpu_info().vmem_capacity_bytes)
    except Exception:
        return 64 << 20


def _choose_batch_tiling(batch):
    """Pick a batch tile (multiple of 8) and padded batch size.

    Small batches: a single grid block with minimal (<=7 row) padding — no
    all-padding second block (on single-TC v5e/v6e the grid is a serial loop,
    so a padding block would just double MXU work). Large batches: 128/256-row
    tiles to fill the MXU M dimension and amortize per-grid-step overhead;
    weights are VMEM-resident so bigger tiles only cost activation VMEM.
    """
    if batch <= 128:
        tile = _round_up(batch, 8)
    elif batch <= 512:
        tile = 128
    else:
        tile = 256
    batch_pad = _round_up(batch, tile)
    return tile, batch_pad


def _fused_mlp_kernel(*refs, num_layers, compute_dtype):
    # refs = (x_ref, w0_ref, b0_ref, w1_ref, b1_ref, ..., o_ref)
    x_ref = refs[0]
    o_ref = refs[-1]
    h = x_ref[...]                                   # (tb, in_pad), compute_dtype
    for li in range(num_layers):
        w_ref = refs[1 + 2 * li]                     # (in_pad_l, out_pad_l)
        b_ref = refs[2 + 2 * li]                     # (1, out_pad_l), f32
        # MXU matmul with compute_dtype operands, f32 accumulation.
        y = jnp.dot(h, w_ref[...], preferred_element_type=jnp.float32)
        # f32 epilogue (bias + ReLU): native on v5e/v6e/v7x VPUs.
        y = y + b_ref[...]
        if li < num_layers - 1:
            # Carry the inter-layer activation in compute_dtype: halves the
            # materialized temporary and the vld/vst bytes between layers.
            h = jnp.maximum(y, 0.0).astype(compute_dtype)
        else:
            h = y
    o_ref[...] = h.astype(o_ref.dtype)


def mlp_forward(x, params, *, compute_dtype=jnp.bfloat16):
    """Fused MLP forward in a single pallas_call.

    x: [B, input_dim]; params: list of (W [in, out], b [out]).
    compute_dtype: MXU operand dtype (default bf16, MXU-native on all TPU
      generations). Accumulation and the bias/ReLU epilogue are always f32.
    """
    B, input_dim = x.shape
    num_layers = len(params)
    out_dim = params[-1][0].shape[1]
    out_dtype = x.dtype

    # Lane-dense padding: every feature dim up to a multiple of 128.
    # TODO(synk): on v6e/v7x, padding K/N to multiples of 256 could better fill
    # the 256-wide MXU for dims in (128, 256); verify on a bundle dump first.
    dims = [input_dim] + [w.shape[1] for (w, _) in params]
    pdims = [_round_up(d, 128) for d in dims]

    batch_tile, batch_pad = _choose_batch_tiling(B)
    grid = (batch_pad // batch_tile,)

    # Zero-pad (and pre-cast) input and parameters. Zero rows/cols contribute
    # nothing to the matmul and ReLU(0) = 0, so padding stays zero through
    # every layer and is sliced off at the end.
    xp = jnp.zeros((batch_pad, pdims[0]), compute_dtype)
    xp = xp.at[:B, :input_dim].set(x.astype(compute_dtype))
    flat_inputs = [xp]
    for li, (w, b) in enumerate(params):
        wp = jnp.zeros((pdims[li], pdims[li + 1]), compute_dtype)
        wp = wp.at[: w.shape[0], : w.shape[1]].set(w.astype(compute_dtype))
        bp = jnp.zeros((1, pdims[li + 1]), jnp.float32)
        bp = bp.at[0, : b.shape[0]].set(b.astype(jnp.float32))
        flat_inputs += [wp, bp]

    # Grid-invariant blocks (constant index_map): fetched once, resident in
    # VMEM for all batch tiles -> single-buffer them (no point paying 2x VMEM
    # for a block that never changes).
    resident = pl.Buffered(1)
    in_specs = [pl.BlockSpec((batch_tile, pdims[0]), lambda i: (i, 0))]
    for li in range(num_layers):
        di, do = pdims[li], pdims[li + 1]
        in_specs.append(
            pl.BlockSpec((di, do), lambda i: (0, 0), pipeline_mode=resident))
        in_specs.append(
            pl.BlockSpec((1, do), lambda i: (0, 0), pipeline_mode=resident))
    out_specs = pl.BlockSpec((batch_tile, pdims[-1]), lambda i: (i, 0))

    # ---- VMEM budget ----
    csize = jnp.dtype(compute_dtype).itemsize
    osize = jnp.dtype(out_dtype).itemsize
    # Weights/biases: single-buffered -> counted once.
    weight_bytes = sum(pdims[l] * pdims[l + 1] * csize + pdims[l + 1] * 4
                       for l in range(num_layers))
    # x / out tiles: double-buffered by the pipeline.
    io_bytes = 2 * batch_tile * (pdims[0] * csize + pdims[-1] * osize)
    # Inter-layer temporaries: f32 accumulator + compute_dtype activation.
    act_bytes = 2 * batch_tile * max(pdims[1:]) * (4 + csize)
    resident_est = weight_bytes + io_bytes + act_bytes

    vmem_cap = _vmem_capacity_bytes()
    # Leave headroom for Mosaic internal scratch: ~56 MiB budget on 64 MiB
    # (v7x) parts, ~112 MiB on 128 MiB (v5e/v6e) parts.
    vmem_budget = min(vmem_cap - (8 << 20), int(vmem_cap * 0.875))
    if resident_est > vmem_budget:
        # The fused-resident-weights design only works while all weights fit
        # in VMEM; larger models need a K/N-tiled grid or emit_pipeline
        # streaming of weight tiles.
        raise ValueError(
            "Fused MLP kernel would need ~%d MiB of VMEM (budget %d MiB);"
            " stream weight tiles (K/N grid + pltpu.emit_pipeline) for models"
            " this large." % (resident_est >> 20, vmem_budget >> 20))
    vmem_limit = int(min(max(resident_est + (4 << 20), 32 << 20), vmem_budget))

    flops = 2 * batch_pad * sum(pdims[l] * pdims[l + 1]
                                for l in range(num_layers))
    bytes_accessed = int(xp.size * csize + weight_bytes
                         + batch_pad * pdims[-1] * osize)

    kernel = functools.partial(_fused_mlp_kernel, num_layers=num_layers,
                               compute_dtype=compute_dtype)
    out_padded = pl.pallas_call(
        kernel,
        out_shape=jax.ShapeDtypeStruct((batch_pad, pdims[-1]), out_dtype),
        grid_spec=pltpu.PrefetchScalarGridSpec(
            num_scalar_prefetch=0,
            grid=grid,
            in_specs=in_specs,
            out_specs=out_specs,
        ),
        compiler_params=pltpu.CompilerParams(
            dimension_semantics=("parallel",),
            vmem_limit_bytes=vmem_limit,
        ),
        cost_estimate=pl.CostEstimate(
            flops=flops, transcendentals=0, bytes_accessed=bytes_accessed),
    )(*flat_inputs)

    return out_padded[:B, :out_dim]


def init_mlp_params(key, input_dim, hidden_dim, output_dim, num_layers,
                    dtype=jnp.float32):
    """Parameter init matching nn.Linear shapes (U(-1/sqrt(fan_in), ...)).

    Returns a list of (W [in, out], b [out]) per layer.
    """
    dims = [input_dim] + [hidden_dim] * (num_layers - 1) + [output_dim]
    params = []
    for li in range(num_layers):
        key, kw, kb = jax.random.split(key, 3)
        fan_in, fan_out = dims[li], dims[li + 1]
        bound = 1.0 / jnp.sqrt(fan_in)
        w = jax.random.uniform(kw, (fan_in, fan_out), dtype, -bound, bound)
        bb = jax.random.uniform(kb, (fan_out,), dtype, -bound, bound)
        params.append((w, bb))
    return params


def mlp_reference(x, params):
    """Pure-JAX reference: ReLU after every layer except the last."""
    n = len(params)
    h = x
    for li, (w, b) in enumerate(params):
        h = h @ w + b
        if li < n - 1:
            h = jnp.maximum(h, 0.0)
    return h


if __name__ == "__main__":
    # Small shapes consistent with the module's forward.
    batch = 8
    input_dim = 32
    hidden_dim = 64
    output_dim = 16
    num_layers = 3

    key = jax.random.PRNGKey(0)
    key, kx = jax.random.split(key)
    x = jax.random.normal(kx, (batch, input_dim), jnp.float32)
    params = init_mlp_params(key, input_dim, hidden_dim, output_dim, num_layers)

    ref = jax.block_until_ready(mlp_reference(x, params))

    # Default path: bf16 MXU operands, f32 accumulation and epilogue.
    out_bf16 = jax.block_until_ready(mlp_forward(x, params))
    assert out_bf16.shape == (batch, output_dim)
    assert jnp.allclose(out_bf16, ref, atol=1e-1, rtol=5e-2)

    # f32 operand path for an exact check against the pure-JAX reference.
    out_f32 = jax.block_until_ready(
        mlp_forward(x, params, compute_dtype=jnp.float32))
    assert out_f32.shape == (batch, output_dim)
    assert jnp.allclose(out_f32, ref, atol=1e-5, rtol=1e-5)

    print("KERNEL_OK")
</pallas_src>

<mosaic_0001>
module attributes {stable_mosaic.version = 11 : i64} {
  func.func @_fused_mlp_kernel(%arg0: i32, %arg1: memref<8x128xbf16, #tpu.memory_space<vmem>>, %arg2: memref<128x128xbf16, #tpu.memory_space<vmem>>, %arg3: memref<1x128xf32, #tpu.memory_space<vmem>>, %arg4: memref<128x128xbf16, #tpu.memory_space<vmem>>, %arg5: memref<1x128xf32, #tpu.memory_space<vmem>>, %arg6: memref<128x128xbf16, #tpu.memory_space<vmem>>, %arg7: memref<1x128xf32, #tpu.memory_space<vmem>>, %arg8: memref<8x128xf32, #tpu.memory_space<vmem>>) attributes {dimension_semantics = [#tpu.dimension_semantics<parallel>], iteration_bounds = array<i64: 1>, scalar_prefetch = 0 : i64, scratch_operands = 0 : i64, tpu.core_type = #tpu.core_type<tc>, window_params = [{transform_indices = @transform_0, window_bounds = array<i64: 8, 128>}, {pipeline_mode = #tpu.pipeline_mode<synchronous>, transform_indices = @transform_1, window_bounds = array<i64: 128, 128>}, {pipeline_mode = #tpu.pipeline_mode<synchronous>, transform_indices = @transform_2, window_bounds = array<i64: 1, 128>}, {pipeline_mode = #tpu.pipeline_mode<synchronous>, transform_indices = @transform_3, window_bounds = array<i64: 128, 128>}, {pipeline_mode = #tpu.pipeline_mode<synchronous>, transform_indices = @transform_4, window_bounds = array<i64: 1, 128>}, {pipeline_mode = #tpu.pipeline_mode<synchronous>, transform_indices = @transform_5, window_bounds = array<i64: 128, 128>}, {pipeline_mode = #tpu.pipeline_mode<synchronous>, transform_indices = @transform_6, window_bounds = array<i64: 1, 128>}, {transform_indices = @transform_7, window_bounds = array<i64: 8, 128>}]} {
    %c0 = arith.constant 0 : index
    %c0_0 = arith.constant 0 : index
    %0 = vector.load %arg1[%c0, %c0_0] : memref<8x128xbf16, #tpu.memory_space<vmem>>, vector<8x128xbf16>
    %c0_1 = arith.constant 0 : index
    %c0_2 = arith.constant 0 : index
    %1 = vector.load %arg2[%c0_1, %c0_2] : memref<128x128xbf16, #tpu.memory_space<vmem>>, vector<128x128xbf16>
    %cst = arith.constant dense<0.000000e+00> : vector<8x128xf32>
    %2 = tpu.matmul %0, %1, %cst {dimension_numbers = #tpu.dot_dimension_numbers<[1], [0], [0], [1], [0, 0, 1, 1], [], []>} : vector<8x128xbf16>, vector<128x128xbf16>, vector<8x128xf32> -> vector<8x128xf32>
    %c0_3 = arith.constant 0 : index
    %c0_4 = arith.constant 0 : index
    %3 = vector.load %arg3[%c0_3, %c0_4] : memref<1x128xf32, #tpu.memory_space<vmem>>, vector<1x128xf32>
    %4 = vector.broadcast %3 : vector<1x128xf32> to vector<8x128xf32>
    %5 = arith.addf %2, %4 : vector<8x128xf32>
    %cst_5 = arith.constant 0.000000e+00 : f32
    %6 = vector.broadcast %cst_5 : f32 to vector<8x128xf32>
    %7 = arith.maximumf %5, %6 : vector<8x128xf32>
    %8 = arith.truncf %7 : vector<8x128xf32> to vector<8x128xbf16>
    %c0_6 = arith.constant 0 : index
    %c0_7 = arith.constant 0 : index
    %9 = vector.load %arg4[%c0_6, %c0_7] : memref<128x128xbf16, #tpu.memory_space<vmem>>, vector<128x128xbf16>
    %cst_8 = arith.constant dense<0.000000e+00> : vector<8x128xf32>
    %10 = tpu.matmul %8, %9, %cst_8 {dimension_numbers = #tpu.dot_dimension_numbers<[1], [0], [0], [1], [0, 0, 1, 1], [], []>} : vector<8x128xbf16>, vector<128x128xbf16>, vector<8x128xf32> -> vector<8x128xf32>
    %c0_9 = arith.constant 0 : index
    %c0_10 = arith.constant 0 : index
    %11 = vector.load %arg5[%c0_9, %c0_10] : memref<1x128xf32, #tpu.memory_space<vmem>>, vector<1x128xf32>
    %12 = vector.broadcast %11 : vector<1x128xf32> to vector<8x128xf32>
    %13 = arith.addf %10, %12 : vector<8x128xf32>
    %cst_11 = arith.constant 0.000000e+00 : f32
    %14 = vector.broadcast %cst_11 : f32 to vector<8x128xf32>
    %15 = arith.maximumf %13, %14 : vector<8x128xf32>
    %16 = arith.truncf %15 : vector<8x128xf32> to vector<8x128xbf16>
    %c0_12 = arith.constant 0 : index
    %c0_13 = arith.constant 0 : index
    %17 = vector.load %arg6[%c0_12, %c0_13] : memref<128x128xbf16, #tpu.memory_space<vmem>>, vector<128x128xbf16>
    %cst_14 = arith.constant dense<0.000000e+00> : vector<8x128xf32>
    %18 = tpu.matmul %16, %17, %cst_14 {dimension_numbers = #tpu.dot_dimension_numbers<[1], [0], [0], [1], [0, 0, 1, 1], [], []>} : vector<8x128xbf16>, vector<128x128xbf16>, vector<8x128xf32> -> vector<8x128xf32>
    %c0_15 = arith.constant 0 : index
    %c0_16 = arith.constant 0 : index
    %19 = vector.load %arg7[%c0_15, %c0_16] : memref<1x128xf32, #tpu.memory_space<vmem>>, vector<1x128xf32>
    %20 = vector.broadcast %19 : vector<1x128xf32> to vector<8x128xf32>
    %21 = arith.addf %18, %20 : vector<8x128xf32>
    %c0_17 = arith.constant 0 : index
    %c0_18 = arith.constant 0 : index
    %22 = vector.load %arg8[%c0_17, %c0_18] : memref<8x128xf32, #tpu.memory_space<vmem>>, vector<8x128xf32>
    tpu.vector_store %arg8[%c0_17, %c0_18], %21 {strides = array<i32>} : memref<8x128xf32, #tpu.memory_space<vmem>>, vector<8x128xf32>,
    return
  }
  func.func @transform_0(%arg0: i32) -> (i32, i32) {
    %c0_i32 = arith.constant 0 : i32
    %c0_i32_0 = arith.constant 0 : i32
    return %arg0, %c0_i32 : i32, i32
  }
  func.func @transform_1(%arg0: i32) -> (i32, i32) {
    %c0_i32 = arith.constant 0 : i32
    %c0_i32_0 = arith.constant 0 : i32
    %c0_i32_1 = arith.constant 0 : i32
    return %c0_i32, %c0_i32_0 : i32, i32
  }
  func.func @transform_2(%arg0: i32) -> (i32, i32) {
    %c0_i32 = arith.constant 0 : i32
    %c0_i32_0 = arith.constant 0 : i32
    %c0_i32_1 = arith.constant 0 : i32
    return %c0_i32, %c0_i32_0 : i32, i32
  }
  func.func @transform_3(%arg0: i32) -> (i32, i32) {
    %c0_i32 = arith.constant 0 : i32
    %c0_i32_0 = arith.constant 0 : i32
    %c0_i32_1 = arith.constant 0 : i32
    return %c0_i32, %c0_i32_0 : i32, i32
  }
  func.func @transform_4(%arg0: i32) -> (i32, i32) {
    %c0_i32 = arith.constant 0 : i32
    %c0_i32_0 = arith.constant 0 : i32
    %c0_i32_1 = arith.constant 0 : i32
    return %c0_i32, %c0_i32_0 : i32, i32
  }
  func.func @transform_5(%arg0: i32) -> (i32, i32) {
    %c0_i32 = arith.constant 0 : i32
    %c0_i32_0 = arith.constant 0 : i32
    %c0_i32_1 = arith.constant 0 : i32
    return %c0_i32, %c0_i32_0 : i32, i32
  }
  func.func @transform_6(%arg0: i32) -> (i32, i32) {
    %c0_i32 = arith.constant 0 : i32
    %c0_i32_0 = arith.constant 0 : i32
    %c0_i32_1 = arith.constant 0 : i32
    return %c0_i32, %c0_i32_0 : i32, i32
  }
  func.func @transform_7(%arg0: i32) -> (i32, i32) {
    %c0_i32 = arith.constant 0 : i32
    %c0_i32_0 = arith.constant 0 : i32
    return %arg0, %c0_i32 : i32, i32
  }
}

</mosaic_0001>

<bundles_post_ra>
// kernel: tpu_custom_call.1
= control target key start
LH: loop header
LB: loop body
LE: loop exit
PB: predicated region body
PF: predicated region fallthrough
CT: control target
= control target key end

     0   :  { %12 = vsyncpa [#allocation3], 0  ;;  %s685_s0 = inlined_call_operand.hbm [shape: bf16[8,128], index: 0, kind: input, shape index: {}]   ;;  %s686_s1 = inlined_call_operand.hbm [shape: bf16[128,128], index: 1, kind: input, shape index: {}]   ;;  %s687_s2 = inlined_call_operand.vmem [shape: f32[1,128], index: 2, kind: input, shape index: {}]   ;;  %s688_s3 = inlined_call_operand.hbm [shape: bf16[128,128], index: 3, kind: input, shape index: {}]   ;;  %s689_s4 = inlined_call_operand.vmem [shape: f32[1,128], index: 4, kind: input, shape index: {}]   ;;  %s690_s5 = inlined_call_operand.hbm [shape: bf16[128,128], index: 5, kind: input, shape index: {}]   ;;  %s691_s6 = inlined_call_operand.vmem [shape: f32[1,128], index: 6, kind: input, shape index: {}]   ;;  %s692_s7 = inlined_call_operand.hbm [shape: f32[8,128], index: 7, kind: output, shape index: {}]  }
   0x1   :  { %13 = vsyncpa [#allocation6], 0 }
   0x2   :  { %14 = vsyncpa [#allocation9], 0  ;;  %s31_s26 = sshll.u32 %s686_s1, 4  ;;  %s32_s26 = int_to_ptr.hbm [resolvable:$true] %s31_s26 }
   0x3   :  { %15 = vsyncpa [#allocation4], 0  ;;  %s614_s27 = smov [#allocation5]   ;;  %s21_s8 = sshll.u32 %s685_s0, 4  ;;  %s22_s8 = int_to_ptr.hbm [resolvable:$true] %s21_s8 }
   0x4   :  { %s33_s28 = sshll.u32 %s614_s27, 4  ;;  %s615_s9 = smov 64   ;;  %s34_s28 = int_to_ptr.vmem [resolvable:$true] %s33_s28 }
   0x5   :  { %s616_s10 = smov 4   ;;  %s617_s11 = smov [#allocation2]  }
   0x6   :  { %39 = dma.hbm_to_vmem [thread:$0]  %s32_s26, 1024, %s34_s28, [#allocation6], %s615_s9, %s615_s9, %s616_s10  }
   0x7   :  { %s23_s12 = sshll.u32 %s617_s11, 4  ;;  %s46_s15 = sshll.u32 %s688_s3, 4  ;;  %s24_s12 = int_to_ptr.vmem [resolvable:$true] %s23_s12  ;;  %s47_s15 = int_to_ptr.hbm [resolvable:$true] %s46_s15 }
   0x8   :  { %26 = dma.hbm_to_vmem [thread:$0]  %s22_s8, 64, %s24_s12, [#allocation3]  }
   0x9   :  { %s61_s17 = sshll.u32 %s690_s5, 4  ;;  %s618_s18 = smov [#allocation7]   ;;  %s62_s17 = int_to_ptr.hbm [resolvable:$true] %s61_s17 }
   0xa   :  { %s48_s19 = sshll.u32 %s618_s18, 4  ;;  %s619_s0 = smov [#allocation8]   ;;  %s49_s19 = int_to_ptr.vmem [resolvable:$true] %s48_s19 }
   0xb   :  { %54 = dma.hbm_to_vmem [thread:$0]  %s47_s15, 1024, %s49_s19, [#allocation6], %s615_s9, %s615_s9, %s616_s10  }
   0xc   :  { %s63_s20 = sshll.u32 %s619_s0, 4  ;;  %s64_s20 = int_to_ptr.vmem [resolvable:$true] %s63_s20 }
   0xd   :  { %69 = dma.hbm_to_vmem [thread:$0]  %s62_s17, 1024, %s64_s20, [#allocation9], %s615_s9, %s615_s9, %s616_s10  }
   0xe   :  { %606 = dma.done.wait [#allocation3], 64  }
   0xf   :  { %607 = vsyncadd [#allocation3], 4294967232 }
  0x10   :  { %608 = dma.done.wait [#allocation6], 2048  }
  0x11   :  { %609 = vsyncadd [#allocation6], 4294965248 }
  0x12   :  { %610 = dma.done.wait [#allocation9], 1024  }
  0x13   :  { %611 = vsyncadd [#allocation9], 4294966272  ;;  %v459_v0 = vld [vmem:[#allocation5 + $0x38] sm:$0xff]  ;;  %v458_v1 = vld [vmem:[#allocation5 + $0x30] sm:$0xff]  ;;  %s620_s24 = smov [#allocation10]   ;;  %s344_s28 = sshll.u32 %s692_s7, 4  ;;  %s345_s28 = int_to_ptr.hbm [resolvable:$true] %s344_s28 }
  0x14   :  { %157 = vmatpush.bf16.msra.mxu0 %v459_v0  ;;  %v467_v2 = vld [vmem:[#allocation7 + $0x38] sm:$0xff]  ;;  %v466_v3 = vld [vmem:[#allocation7 + $0x30] sm:$0xff]  ;;  %v457_v4 = vld [vmem:[#allocation5 + $0x28] sm:$0xff]  ;;  %s342_s25 = sshll.u32 %s620_s24, 4  ;;  %s343_s25 = int_to_ptr.vmem [resolvable:$true] %s342_s25 }
  0x15   :  { %240 = vmatpush.bf16.msra.mxu1 %v467_v2  ;;  %v465_v5 = vld [vmem:[#allocation7 + $0x28] sm:$0xff]  ;;  %v456_v6 = vld [vmem:[#allocation5 + $0x20] sm:$0xff]  ;;  %v455_v8 = vld [vmem:[#allocation5 + $0x18] sm:$0xff] }
  0x16   :  { %v464_v7 = vld [vmem:[#allocation7 + $0x20] sm:$0xff]  ;;  %v463_v9 = vld [vmem:[#allocation7 + $0x18] sm:$0xff]  ;;  %v454_v10 = vld [vmem:[#allocation5 + $0x10] sm:$0xff] }
  0x17   :  { %v462_v11 = vld [vmem:[#allocation7 + $0x10] sm:$0xff]  ;;  %v453_v12 = vld [vmem:[#allocation5 + $0x8] sm:$0xff]  ;;  %v452_v13 = vld [vmem:[#allocation5] sm:$0xff] }
  0x18   :  { %158 = vmatpush.bf16.msra.mxu0 %v458_v1  ;;  %v88_v14 = vld [vmem:[#allocation2] sm:$0xf]  ;;  %v461_v15 = vld [vmem:[#allocation7 + $0x8] sm:$0xff]  ;;  %v460_v16 = vld [vmem:[#allocation7] sm:$0xff] }
  0x19   :  { %241 = vmatpush.bf16.msra.mxu1 %v466_v3  ;;  %v475_v17 = vld [vmem:[#allocation8 + $0x38] sm:$0xff]  ;;  %v474_v18 = vld [vmem:[#allocation8 + $0x30] sm:$0xff]  ;;  %v473_v19 = vld [vmem:[#allocation8 + $0x28] sm:$0xff] }
  0x1a   :  { %323 = vmatpush.bf16.msra.mxu2 %v475_v17  ;;  %v472_v20 = vld [vmem:[#allocation8 + $0x20] sm:$0xff]  ;;  %v471_v21 = vld [vmem:[#allocation8 + $0x18] sm:$0xff]  ;;  %v470_v22 = vld [vmem:[#allocation8 + $0x10] sm:$0xff] }
  0x1b   :  { %v483_v23 = vld [vmem:[%s687_s2] ss:$0 sm:$0xff]  ;;  %v469_v29 = vld [vmem:[#allocation8 + $0x8] sm:$0xff]  ;;  %v468_v30 = vld [vmem:[#allocation8] sm:$0xff] }
  0x1c   :  { %159 = vmatpush.bf16.msra.mxu0 %v457_v4  ;;  %v484_v31 = vld [vmem:[%s689_s4] ss:$0 sm:$0xff] }
  0x1d   :  { %242 = vmatpush.bf16.msra.mxu1 %v465_v5  ;;  %v485_v37 = vld [vmem:[%s691_s6] ss:$0 sm:$0xff] }
  0x1e   :  { %324 = vmatpush.bf16.msra.mxu2 %v474_v18 }
  0x20   :  { %160 = vmatpush.bf16.msra.mxu0 %v456_v6 }
  0x21   :  { %243 = vmatpush.bf16.msra.mxu1 %v464_v7 }
  0x22   :  { %325 = vmatpush.bf16.msra.mxu2 %v473_v19 }
  0x24   :  { %161 = vmatpush.bf16.msra.mxu0 %v455_v8 }
  0x25   :  { %244 = vmatpush.bf16.msra.mxu1 %v463_v9 }
  0x26   :  { %326 = vmatpush.bf16.msra.mxu2 %v472_v20 }
  0x28   :  { %162 = vmatpush.bf16.msra.mxu0 %v454_v10 }
  0x29   :  { %245 = vmatpush.bf16.msra.mxu1 %v462_v11 }
  0x2a   :  { %327 = vmatpush.bf16.msra.mxu2 %v471_v21 }
  0x2c   :  { %163 = vmatpush.bf16.msra.mxu0 %v453_v12 }
  0x2d   :  { %246 = vmatpush.bf16.msra.mxu1 %v461_v15 }
  0x2e   :  { %328 = vmatpush.bf16.msra.mxu2 %v470_v22 }
  0x30   :  { %164 = vmatpush.bf16.msra.mxu0 %v452_v13 }
  0x31   :  { %247 = vmatpush.bf16.msra.mxu1 %v460_v16 }
  0x32   :  { %329 = vmatpush.bf16.msra.mxu2 %v469_v29 }
  0x33   :  { %165 = vmatmul.bf16.vlgmr.msra.gmra.mxu0 %v88_v14 }
  0x36   :  { %330 = vmatpush.bf16.msra.mxu2 %v468_v30 }
  0xb0   :  { %v166_v24 = vpop.f32.mrf.mxu0 }
  0xb1   :  { %v167_v25 = vadd.f32 %v483_v23, %v166_v24 }
  0xb3   :  { %v170_v26 = vmax.f32 %v167_v25, 0.0 }
  0xb5   :  { %v171_v27 = vpack.c.bf16 %v170_v26, %v170_v26 }
  0xb7   :  { %248 = vmatmul.bf16.vlgmr.msra.gmra.mxu1 %v171_v27 }
  0xb8   :  { %v168_v28 = vpop.f32.mrf.mxu0 }
 0x134   :  { %v249_v32 = vpop.f32.mrf.mxu1 }
 0x135   :  { %v250_v33 = vadd.f32 %v484_v31, %v249_v32 }
 0x137   :  { %v253_v34 = vmax.f32 %v250_v33, 0.0 }
 0x139   :  { %v254_v35 = vpack.c.bf16 %v253_v34, %v253_v34 }
 0x13b   :  { %331 = vmatmul.bf16.vlgmr.msra.gmra.mxu2 %v254_v35 }
 0x13c   :  { %v251_v36 = vpop.f32.mrf.mxu1 }
 0x1be   :  { %v332_v38 = vpop.f32.mrf.mxu2 }
 0x1bf   :  { %v333_v39 = vadd.f32 %v485_v37, %v332_v38 }
 0x1c1   :  { %336 = vst [vmem:[#allocation10] sm:$0xff] %v333_v39 }
 0x1c2   :  { %347 = dma.vmem_to_hbm [thread:$0]  %s343_s25, 128, %s345_s28, [#allocation4]  }
 0x1c6   :  { %v334_v40 = vpop.f32.mrf.mxu2 }
 0x1c7   :  { %612 = dma.done.wait [#allocation4], 128  }
 0x1c8   :  { %613 = vsyncadd [#allocation4], 4294967168 }
 0x1c9   :  { %352 = vsyncpa [#allocation3], 1 }
 0x1ca   :  { %353 = vsyncpa [#allocation6], 1 }
 0x1cb   :  { %354 = vsyncpa [#allocation9], 1 }
 0x1cc   :  { %355 = vsyncpa [#allocation4], 1 }

</bundles_post_ra>
